<compile_context>
chip_gen: v5e
topology: v5e:2x2
jax: 0.10.0
libtpu: 0.0.40
codegen_flags: <defaults>
</compile_context>

<pallas_src>
import functools

import jax
import jax.numpy as jnp
from jax import lax
from jax.experimental import pallas as pl
from jax.experimental.pallas import tpu as pltpu

LANE = 128
SUBLANE = 8


def _round_up(v, m):
    return (v + m - 1) // m * m


def _prelu(z, a):
    return jnp.where(z >= 0, z, a * z)


# ---------------------------------------------------------------------------
# Kernels
# ---------------------------------------------------------------------------

def fc1_kernel(alpha_ref, x_ref, w1_ref, b1_ref, out_ref):
    """h = PReLU(x @ W1 + b1); bf16 MXU inputs, f32 accumulate, f32 epilogue."""
    z = jnp.dot(x_ref[...], w1_ref[...], preferred_element_type=jnp.float32)
    z = z + b1_ref[...]
    out_ref[...] = _prelu(z, alpha_ref[0]).astype(out_ref.dtype)


def gcn_layer_kernel(alpha_ref, adj_ref, h_ref, wg_ref, bg_ref, out_ref, acc_ref):
    """Tiled agg = adj @ h with f32 accumulator; fused Linear+bias+PReLU at last k."""
    k = pl.program_id(1)

    @pl.when(k == 0)
    def _():
        acc_ref[...] = jnp.zeros_like(acc_ref)

    acc_ref[...] += jnp.dot(adj_ref[...], h_ref[...],
                            preferred_element_type=jnp.float32)

    @pl.when(k == pl.num_programs(1) - 1)
    def _():
        agg = acc_ref[...].astype(jnp.bfloat16)
        z = jnp.dot(agg, wg_ref[...], preferred_element_type=jnp.float32)
        z = z + bg_ref[...]
        out_ref[...] = _prelu(z, alpha_ref[0]).astype(out_ref.dtype)


def pool_fc2_kernel(pool_ref, h_ref, w2_ref, b2_ref, out_ref, acc_ref):
    """hg = pool @ h (reduction over node tiles), then L2-normalize + fc2."""
    k = pl.program_id(0)

    @pl.when(k == 0)
    def _():
        acc_ref[...] = jnp.zeros_like(acc_ref)

    acc_ref[...] += jnp.dot(pool_ref[...], h_ref[...],
                            preferred_element_type=jnp.float32)

    @pl.when(k == pl.num_programs(0) - 1)
    def _():
        hg = acc_ref[...]
        # torch F.normalize(p=2, dim=1, eps=1e-12): x / max(||x||, eps)
        sq = jnp.sum(hg * hg, axis=1, keepdims=True)
        hg = hg * lax.rsqrt(jnp.maximum(sq, 1e-24))
        z = jnp.dot(hg.astype(jnp.bfloat16), w2_ref[...],
                    preferred_element_type=jnp.float32)
        out_ref[...] = z + b2_ref[...]


# ---------------------------------------------------------------------------
# Wrapper
# ---------------------------------------------------------------------------

@functools.partial(jax.jit, static_argnames=("num_graphs",))
def gnn_forward(x, edge_index, edge_attr, batch, params, *, num_graphs):
    """Forward pass matching GNN.forward semantics.

    x:          [N, F]  float32 node features
    edge_index: [2, E]  int32, row 0 = src, row 1 = dst
    edge_attr:  [E]     float32 scalar edge weights
    batch:      [N]     int32 graph id per node
    """
    n, f = x.shape
    (w1, b1, wg1, bg1, wg2, bg2, w2, b2, alphas) = params
    h_dim = w1.shape[1]
    o_dim = w2.shape[1]

    # ---- padded / tiled sizes ----
    tile = 256                               # 256-granule tiles for v6e/v7x MXUs
    np_ = _round_up(n, LANE)
    if np_ > tile:
        np_ = _round_up(n, tile)
        tm = tk = tile
    else:
        tm = tk = np_                        # single tile (still a 128 multiple)
    hp = _round_up(h_dim, LANE)              # lane-pad hidden dim to 128
    op = _round_up(o_dim, LANE)              # lane-dense output stores
    gp = _round_up(num_graphs, SUBLANE)
    num_row = np_ // tm
    num_k = np_ // tk

    # ---- plain-JAX glue: densify + pad + cast to bf16 ----
    xp = jnp.zeros((np_, f), jnp.bfloat16).at[:n, :].set(x.astype(jnp.bfloat16))

    src, dst = edge_index[0], edge_index[1]
    adj = jnp.zeros((np_, np_), jnp.float32).at[dst, src].add(edge_attr)
    adj = adj.astype(jnp.bfloat16)

    batch_p = jnp.full((np_,), -1, jnp.int32).at[:n].set(batch.astype(jnp.int32))
    one_hot = (batch_p[None, :] ==
               jnp.arange(gp, dtype=jnp.int32)[:, None]).astype(jnp.float32)
    counts = jnp.maximum(one_hot.sum(axis=1, keepdims=True), 1.0)
    pool = (one_hot / counts).astype(jnp.bfloat16)       # [gp, np_]

    def pad_w(w, r, c):
        return (jnp.zeros((r, c), jnp.bfloat16)
                .at[:w.shape[0], :w.shape[1]].set(w.astype(jnp.bfloat16)))

    def pad_b(b, c):
        return (jnp.zeros((1, c), jnp.float32)
                .at[0, :b.shape[0]].set(b.astype(jnp.float32)))

    w1p = pad_w(w1, f, hp)
    wg1p = pad_w(wg1, hp, hp)
    wg2p = pad_w(wg2, hp, hp)
    w2p = pad_w(w2, hp, op)
    b1p, bg1p, bg2p, b2p = pad_b(b1, hp), pad_b(bg1, hp), pad_b(bg2, hp), pad_b(b2, op)

    a_fc1 = alphas[0].reshape(1).astype(jnp.float32)
    a_gc1 = alphas[1].reshape(1).astype(jnp.float32)
    a_gc2 = alphas[2].reshape(1).astype(jnp.float32)

    smem_spec = pl.BlockSpec(memory_space=pltpu.MemorySpace.SMEM)

    # ---- fc1 + PReLU (row-parallel) ----
    h0 = pl.pallas_call(
        fc1_kernel,
        out_shape=jax.ShapeDtypeStruct((np_, hp), jnp.bfloat16),
        grid=(num_row,),
        in_specs=[
            smem_spec,                                   # alpha
            pl.BlockSpec((tm, f), lambda i: (i, 0)),     # x
            pl.BlockSpec((f, hp), lambda i: (0, 0)),     # W1
            pl.BlockSpec((1, hp), lambda i: (0, 0)),     # b1
        ],
        out_specs=pl.BlockSpec((tm, hp), lambda i: (i, 0)),
        compiler_params=pltpu.CompilerParams(
            dimension_semantics=("parallel",)),
    )(a_fc1, xp, w1p, b1p)

    # ---- gc layers: tiled adj aggregation + fused Linear + PReLU ----
    gcn_call = pl.pallas_call(
        gcn_layer_kernel,
        out_shape=jax.ShapeDtypeStruct((np_, hp), jnp.bfloat16),
        grid=(num_row, num_k),                           # reduction axis last
        in_specs=[
            smem_spec,                                       # alpha
            pl.BlockSpec((tm, tk), lambda i, k: (i, k)),     # adj tile
            pl.BlockSpec((tk, hp), lambda i, k: (k, 0)),     # h tile
            pl.BlockSpec((hp, hp), lambda i, k: (0, 0)),     # Wg
            pl.BlockSpec((1, hp), lambda i, k: (0, 0)),      # bg
        ],
        out_specs=pl.BlockSpec((tm, hp), lambda i, k: (i, 0)),
        scratch_shapes=[pltpu.VMEM((tm, hp), jnp.float32)],
        compiler_params=pltpu.CompilerParams(
            dimension_semantics=("parallel", "arbitrary"),
            vmem_limit_bytes=48 * 1024 * 1024),
    )
    h1 = gcn_call(a_gc1, adj, h0, wg1p, bg1p)
    h2 = gcn_call(a_gc2, adj, h1, wg2p, bg2p)

    # ---- global mean pool -> L2 normalize -> fc2 ----
    out_p = pl.pallas_call(
        pool_fc2_kernel,
        out_shape=jax.ShapeDtypeStruct((gp, op), jnp.float32),
        grid=(num_k,),
        in_specs=[
            pl.BlockSpec((gp, tk), lambda k: (0, k)),    # pool tile
            pl.BlockSpec((tk, hp), lambda k: (k, 0)),    # h tile
            pl.BlockSpec((hp, op), lambda k: (0, 0)),    # W2
            pl.BlockSpec((1, op), lambda k: (0, 0)),     # b2
        ],
        out_specs=pl.BlockSpec((gp, op), lambda k: (0, 0)),
        scratch_shapes=[pltpu.VMEM((gp, hp), jnp.float32)],
        compiler_params=pltpu.CompilerParams(
            dimension_semantics=("arbitrary",)),
    )(pool, h2, w2p, b2p)

    return out_p[:num_graphs, :o_dim]


# ---------------------------------------------------------------------------
# Params + pure-JAX f32 reference
# ---------------------------------------------------------------------------

def init_params(key, dim_node_feat, dim_hidden, dim_out):
    ks = jax.random.split(key, 8)
    scale = 0.1
    w1 = scale * jax.random.normal(ks[0], (dim_node_feat, dim_hidden), jnp.float32)
    b1 = scale * jax.random.normal(ks[1], (dim_hidden,), jnp.float32)
    wg1 = scale * jax.random.normal(ks[2], (dim_hidden, dim_hidden), jnp.float32)
    bg1 = scale * jax.random.normal(ks[3], (dim_hidden,), jnp.float32)
    wg2 = scale * jax.random.normal(ks[4], (dim_hidden, dim_hidden), jnp.float32)
    bg2 = scale * jax.random.normal(ks[5], (dim_hidden,), jnp.float32)
    w2 = scale * jax.random.normal(ks[6], (dim_hidden, dim_out), jnp.float32)
    b2 = scale * jax.random.normal(ks[7], (dim_out,), jnp.float32)
    alphas = jnp.array([0.25, 0.25, 0.25], jnp.float32)   # PReLU default init
    return (w1, b1, wg1, bg1, wg2, bg2, w2, b2, alphas)


def reference_forward(x, edge_index, edge_attr, batch, params, num_graphs):
    """Pure-JAX f32 reference mirroring the module semantics."""
    (w1, b1, wg1, bg1, wg2, bg2, w2, b2, alphas) = params
    n = x.shape[0]
    src, dst = edge_index[0], edge_index[1]
    adj = jnp.zeros((n, n), jnp.float32).at[dst, src].add(edge_attr)
    one_hot = (batch[None, :] == jnp.arange(num_graphs)[:, None]).astype(jnp.float32)
    pool = one_hot / jnp.maximum(one_hot.sum(axis=1, keepdims=True), 1.0)

    h = _prelu(x @ w1 + b1, alphas[0])
    h = _prelu((adj @ h) @ wg1 + bg1, alphas[1])
    h = _prelu((adj @ h) @ wg2 + bg2, alphas[2])
    hg = pool @ h
    hg = hg / jnp.maximum(jnp.linalg.norm(hg, axis=1, keepdims=True), 1e-12)
    return hg @ w2 + b2


if __name__ == "__main__":
    # Small synthetic graph batch: N nodes across G graphs.
    N, F, H, O, E, G = 16, 8, 32, 4, 40, 2

    key = jax.random.PRNGKey(0)
    k_x, k_src, k_dst, k_attr, k_params = jax.random.split(key, 5)

    x = jax.random.normal(k_x, (N, F), jnp.float32)
    src = jax.random.randint(k_src, (E,), 0, N, jnp.int32)
    dst = jax.random.randint(k_dst, (E,), 0, N, jnp.int32)
    edge_index = jnp.stack([src, dst], axis=0)
    edge_attr = jax.random.uniform(k_attr, (E,), jnp.float32)
    # First half of nodes -> graph 0, second half -> graph 1.
    batch = jnp.concatenate([jnp.zeros(N // 2, jnp.int32),
                             jnp.ones(N - N // 2, jnp.int32)])

    params = init_params(k_params, F, H, O)

    out = gnn_forward(x, edge_index, edge_attr, batch, params, num_graphs=G)
    out = jax.block_until_ready(out)

    ref = reference_forward(x, edge_index, edge_attr, batch, params, G)
    assert out.shape == (G, O)
    # bf16 MXU inputs vs f32 reference -> looser tolerance than the f32 kernel.
    assert jnp.allclose(out, ref, atol=2e-2, rtol=2e-2), "mismatch vs reference"

    print("KERNEL_OK")
</pallas_src>

<mosaic_0001>
module attributes {stable_mosaic.version = 11 : i64} {
  func.func @fc1_kernel(%arg0: i32, %arg1: memref<1xf32, #tpu.memory_space<smem>>, %arg2: memref<128x8xbf16, #tpu.memory_space<vmem>>, %arg3: memref<8x128xbf16, #tpu.memory_space<vmem>>, %arg4: memref<1x128xf32, #tpu.memory_space<vmem>>, %arg5: memref<128x128xbf16, #tpu.memory_space<vmem>>) attributes {dimension_semantics = [#tpu.dimension_semantics<parallel>], iteration_bounds = array<i64: 1>, scalar_prefetch = 0 : i64, scratch_operands = 0 : i64, tpu.core_type = #tpu.core_type<tc>, window_params = [{transform_indices = @transform_0, window_bounds = array<i64: 1>}, {transform_indices = @transform_1, window_bounds = array<i64: 128, 8>}, {pipeline_mode = #tpu.pipeline_mode<synchronous>, transform_indices = @transform_2, window_bounds = array<i64: 8, 128>}, {pipeline_mode = #tpu.pipeline_mode<synchronous>, transform_indices = @transform_3, window_bounds = array<i64: 1, 128>}, {transform_indices = @transform_4, window_bounds = array<i64: 128, 128>}]} {
    %c0 = arith.constant 0 : index
    %c0_0 = arith.constant 0 : index
    %0 = vector.load %arg2[%c0, %c0_0] : memref<128x8xbf16, #tpu.memory_space<vmem>>, vector<128x8xbf16>
    %c0_1 = arith.constant 0 : index
    %c0_2 = arith.constant 0 : index
    %1 = vector.load %arg3[%c0_1, %c0_2] : memref<8x128xbf16, #tpu.memory_space<vmem>>, vector<8x128xbf16>
    %cst = arith.constant dense<0.000000e+00> : vector<128x128xf32>
    %2 = tpu.matmul %0, %1, %cst {dimension_numbers = #tpu.dot_dimension_numbers<[1], [0], [0], [1], [0, 0, 1, 1], [], []>} : vector<128x8xbf16>, vector<8x128xbf16>, vector<128x128xf32> -> vector<128x128xf32>
    %c0_3 = arith.constant 0 : index
    %c0_4 = arith.constant 0 : index
    %3 = vector.load %arg4[%c0_3, %c0_4] : memref<1x128xf32, #tpu.memory_space<vmem>>, vector<1x128xf32>
    %4 = vector.broadcast %3 : vector<1x128xf32> to vector<128x128xf32>
    %5 = arith.addf %2, %4 : vector<128x128xf32>
    %c0_5 = arith.constant 0 : index
    %6 = memref.load %arg1[%c0_5] : memref<1xf32, #tpu.memory_space<smem>>
    %cst_6 = arith.constant 0.000000e+00 : f32
    %7 = vector.broadcast %cst_6 : f32 to vector<128x128xf32>
    %8 = arith.cmpf oge, %5, %7 : vector<128x128xf32>
    %9 = vector.broadcast %6 : f32 to vector<128x128xf32>
    %10 = arith.mulf %9, %5 : vector<128x128xf32>
    %11 = arith.select %8, %5, %10 : vector<128x128xi1>, vector<128x128xf32>
    %12 = arith.truncf %11 : vector<128x128xf32> to vector<128x128xbf16>
    %c0_7 = arith.constant 0 : index
    %c0_8 = arith.constant 0 : index
    %13 = vector.load %arg5[%c0_7, %c0_8] : memref<128x128xbf16, #tpu.memory_space<vmem>>, vector<128x128xbf16>
    tpu.vector_store %arg5[%c0_7, %c0_8], %12 {strides = array<i32>} : memref<128x128xbf16, #tpu.memory_space<vmem>>, vector<128x128xbf16>,
    return
  }
  func.func @transform_0(%arg0: i32) -> i32 {
    %c0_i32 = arith.constant 0 : i32
    %c0_i32_0 = arith.constant 0 : i32
    return %c0_i32 : i32
  }
  func.func @transform_1(%arg0: i32) -> (i32, i32) {
    %c0_i32 = arith.constant 0 : i32
    %c0_i32_0 = arith.constant 0 : i32
    return %arg0, %c0_i32 : i32, i32
  }
  func.func @transform_2(%arg0: i32) -> (i32, i32) {
    %c0_i32 = arith.constant 0 : i32
    %c0_i32_0 = arith.constant 0 : i32
    %c0_i32_1 = arith.constant 0 : i32
    return %c0_i32, %c0_i32_0 : i32, i32
  }
  func.func @transform_3(%arg0: i32) -> (i32, i32) {
    %c0_i32 = arith.constant 0 : i32
    %c0_i32_0 = arith.constant 0 : i32
    %c0_i32_1 = arith.constant 0 : i32
    return %c0_i32, %c0_i32_0 : i32, i32
  }
  func.func @transform_4(%arg0: i32) -> (i32, i32) {
    %c0_i32 = arith.constant 0 : i32
    %c0_i32_0 = arith.constant 0 : i32
    return %arg0, %c0_i32 : i32, i32
  }
}

module attributes {stable_mosaic.version = 11 : i64} {
  func.func @gcn_layer_kernel(%arg0: i32, %arg1: i32, %arg2: memref<1xf32, #tpu.memory_space<smem>>, %arg3: memref<128x128xbf16, #tpu.memory_space<vmem>>, %arg4: memref<128x128xbf16, #tpu.memory_space<vmem>>, %arg5: memref<128x128xbf16, #tpu.memory_space<vmem>>, %arg6: memref<1x128xf32, #tpu.memory_space<vmem>>, %arg7: memref<128x128xbf16, #tpu.memory_space<vmem>>, %arg8: memref<128x128xf32, #tpu.memory_space<vmem>>) attributes {dimension_semantics = [#tpu.dimension_semantics<parallel>, #tpu.dimension_semantics<arbitrary>], iteration_bounds = array<i64: 1, 1>, scalar_prefetch = 0 : i64, scratch_operands = 1 : i64, tpu.core_type = #tpu.core_type<tc>, window_params = [{transform_indices = @transform_0, window_bounds = array<i64: 1>}, {transform_indices = @transform_1, window_bounds = array<i64: 128, 128>}, {transform_indices = @transform_2, window_bounds = array<i64: 128, 128>}, {pipeline_mode = #tpu.pipeline_mode<synchronous>, transform_indices = @transform_3, window_bounds = array<i64: 128, 128>}, {pipeline_mode = #tpu.pipeline_mode<synchronous>, transform_indices = @transform_4, window_bounds = array<i64: 1, 128>}, {transform_indices = @transform_5, window_bounds = array<i64: 128, 128>}]} {
    %c0_i32 = arith.constant 0 : i32
    %0 = arith.cmpi eq, %arg1, %c0_i32 : i32
    %1 = arith.extui %0 : i1 to i32
    %c0_i32_0 = arith.constant 0 : i32
    %2 = arith.cmpi ne, %1, %c0_i32_0 : i32
    scf.if %2 {
      %cst_10 = arith.constant 0.000000e+00 : f32
      %12 = vector.broadcast %cst_10 : f32 to vector<128x128xf32>
      %c0_11 = arith.constant 0 : index
      %c0_12 = arith.constant 0 : index
      %13 = vector.load %arg8[%c0_11, %c0_12] : memref<128x128xf32, #tpu.memory_space<vmem>>, vector<128x128xf32>
      tpu.vector_store %arg8[%c0_11, %c0_12], %12 {strides = array<i32>} : memref<128x128xf32, #tpu.memory_space<vmem>>, vector<128x128xf32>,
    } else {
    }
    %c0 = arith.constant 0 : index
    %c0_1 = arith.constant 0 : index
    %3 = vector.load %arg8[%c0, %c0_1] : memref<128x128xf32, #tpu.memory_space<vmem>>, vector<128x128xf32>
    %c0_2 = arith.constant 0 : index
    %c0_3 = arith.constant 0 : index
    %4 = vector.load %arg3[%c0_2, %c0_3] : memref<128x128xbf16, #tpu.memory_space<vmem>>, vector<128x128xbf16>
    %c0_4 = arith.constant 0 : index
    %c0_5 = arith.constant 0 : index
    %5 = vector.load %arg4[%c0_4, %c0_5] : memref<128x128xbf16, #tpu.memory_space<vmem>>, vector<128x128xbf16>
    %cst = arith.constant dense<0.000000e+00> : vector<128x128xf32>
    %6 = tpu.matmul %4, %5, %cst {dimension_numbers = #tpu.dot_dimension_numbers<[1], [0], [0], [1], [0, 0, 1, 1], [], []>} : vector<128x128xbf16>, vector<128x128xbf16>, vector<128x128xf32> -> vector<128x128xf32>
    %7 = arith.addf %3, %6 : vector<128x128xf32>
    %c0_6 = arith.constant 0 : index
    %c0_7 = arith.constant 0 : index
    %8 = vector.load %arg8[%c0_6, %c0_7] : memref<128x128xf32, #tpu.memory_space<vmem>>, vector<128x128xf32>
    tpu.vector_store %arg8[%c0_6, %c0_7], %7 {strides = array<i32>} : memref<128x128xf32, #tpu.memory_space<vmem>>, vector<128x128xf32>,
    %c0_i32_8 = arith.constant 0 : i32
    %9 = arith.cmpi eq, %arg1, %c0_i32_8 : i32
    %10 = arith.extui %9 : i1 to i32
    %c0_i32_9 = arith.constant 0 : i32
    %11 = arith.cmpi ne, %10, %c0_i32_9 : i32
    scf.if %11 {
      %c0_10 = arith.constant 0 : index
      %c0_11 = arith.constant 0 : index
      %12 = vector.load %arg8[%c0_10, %c0_11] : memref<128x128xf32, #tpu.memory_space<vmem>>, vector<128x128xf32>
      %13 = arith.truncf %12 : vector<128x128xf32> to vector<128x128xbf16>
      %c0_12 = arith.constant 0 : index
      %c0_13 = arith.constant 0 : index
      %14 = vector.load %arg5[%c0_12, %c0_13] : memref<128x128xbf16, #tpu.memory_space<vmem>>, vector<128x128xbf16>
      %cst_14 = arith.constant dense<0.000000e+00> : vector<128x128xf32>
      %15 = tpu.matmul %13, %14, %cst_14 {dimension_numbers = #tpu.dot_dimension_numbers<[1], [0], [0], [1], [0, 0, 1, 1], [], []>} : vector<128x128xbf16>, vector<128x128xbf16>, vector<128x128xf32> -> vector<128x128xf32>
      %c0_15 = arith.constant 0 : index
      %c0_16 = arith.constant 0 : index
      %16 = vector.load %arg6[%c0_15, %c0_16] : memref<1x128xf32, #tpu.memory_space<vmem>>, vector<1x128xf32>
      %17 = vector.broadcast %16 : vector<1x128xf32> to vector<128x128xf32>
      %18 = arith.addf %15, %17 : vector<128x128xf32>
      %c0_17 = arith.constant 0 : index
      %19 = memref.load %arg2[%c0_17] : memref<1xf32, #tpu.memory_space<smem>>
      %cst_18 = arith.constant 0.000000e+00 : f32
      %20 = vector.broadcast %cst_18 : f32 to vector<128x128xf32>
      %21 = arith.cmpf oge, %18, %20 : vector<128x128xf32>
      %22 = vector.broadcast %19 : f32 to vector<128x128xf32>
      %23 = arith.mulf %22, %18 : vector<128x128xf32>
      %24 = arith.select %21, %18, %23 : vector<128x128xi1>, vector<128x128xf32>
      %25 = arith.truncf %24 : vector<128x128xf32> to vector<128x128xbf16>
      %c0_19 = arith.constant 0 : index
      %c0_20 = arith.constant 0 : index
      %26 = vector.load %arg7[%c0_19, %c0_20] : memref<128x128xbf16, #tpu.memory_space<vmem>>, vector<128x128xbf16>
      tpu.vector_store %arg7[%c0_19, %c0_20], %25 {strides = array<i32>} : memref<128x128xbf16, #tpu.memory_space<vmem>>, vector<128x128xbf16>,
    } else {
    }
    return
  }
  func.func @transform_0(%arg0: i32, %arg1: i32) -> i32 {
    %c0_i32 = arith.constant 0 : i32
    %c0_i32_0 = arith.constant 0 : i32
    return %c0_i32 : i32
  }
  func.func @transform_1(%arg0: i32, %arg1: i32) -> (i32, i32) {
    %c0_i32 = arith.constant 0 : i32
    return %arg0, %arg1 : i32, i32
  }
  func.func @transform_2(%arg0: i32, %arg1: i32) -> (i32, i32) {
    %c0_i32 = arith.constant 0 : i32
    %c0_i32_0 = arith.constant 0 : i32
    return %arg1, %c0_i32 : i32, i32
  }
  func.func @transform_3(%arg0: i32, %arg1: i32) -> (i32, i32) {
    %c0_i32 = arith.constant 0 : i32
    %c0_i32_0 = arith.constant 0 : i32
    %c0_i32_1 = arith.constant 0 : i32
    return %c0_i32, %c0_i32_0 : i32, i32
  }
  func.func @transform_4(%arg0: i32, %arg1: i32) -> (i32, i32) {
    %c0_i32 = arith.constant 0 : i32
    %c0_i32_0 = arith.constant 0 : i32
    %c0_i32_1 = arith.constant 0 : i32
    return %c0_i32, %c0_i32_0 : i32, i32
  }
  func.func @transform_5(%arg0: i32, %arg1: i32) -> (i32, i32) {
    %c0_i32 = arith.constant 0 : i32
    %c0_i32_0 = arith.constant 0 : i32
    return %arg0, %c0_i32 : i32, i32
  }
}

module attributes {stable_mosaic.version = 11 : i64} {
  func.func @pool_fc2_kernel(%arg0: i32, %arg1: memref<8x128xbf16, #tpu.memory_space<vmem>>, %arg2: memref<128x128xbf16, #tpu.memory_space<vmem>>, %arg3: memref<128x128xbf16, #tpu.memory_space<vmem>>, %arg4: memref<1x128xf32, #tpu.memory_space<vmem>>, %arg5: memref<8x128xf32, #tpu.memory_space<vmem>>, %arg6: memref<8x128xf32, #tpu.memory_space<vmem>>) attributes {dimension_semantics = [#tpu.dimension_semantics<arbitrary>], iteration_bounds = array<i64: 1>, scalar_prefetch = 0 : i64, scratch_operands = 1 : i64, tpu.core_type = #tpu.core_type<tc>, window_params = [{transform_indices = @transform_0, window_bounds = array<i64: 8, 128>}, {transform_indices = @transform_1, window_bounds = array<i64: 128, 128>}, {pipeline_mode = #tpu.pipeline_mode<synchronous>, transform_indices = @transform_2, window_bounds = array<i64: 128, 128>}, {pipeline_mode = #tpu.pipeline_mode<synchronous>, transform_indices = @transform_3, window_bounds = array<i64: 1, 128>}, {pipeline_mode = #tpu.pipeline_mode<synchronous>, transform_indices = @transform_4, window_bounds = array<i64: 8, 128>}]} {
    %c0_i32 = arith.constant 0 : i32
    %0 = arith.cmpi eq, %arg0, %c0_i32 : i32
    %1 = arith.extui %0 : i1 to i32
    %c0_i32_0 = arith.constant 0 : i32
    %2 = arith.cmpi ne, %1, %c0_i32_0 : i32
    scf.if %2 {
      %cst_10 = arith.constant 0.000000e+00 : f32
      %12 = vector.broadcast %cst_10 : f32 to vector<8x128xf32>
      %c0_11 = arith.constant 0 : index
      %c0_12 = arith.constant 0 : index
      %13 = vector.load %arg6[%c0_11, %c0_12] : memref<8x128xf32, #tpu.memory_space<vmem>>, vector<8x128xf32>
      tpu.vector_store %arg6[%c0_11, %c0_12], %12 {strides = array<i32>} : memref<8x128xf32, #tpu.memory_space<vmem>>, vector<8x128xf32>,
    } else {
    }
    %c0 = arith.constant 0 : index
    %c0_1 = arith.constant 0 : index
    %3 = vector.load %arg6[%c0, %c0_1] : memref<8x128xf32, #tpu.memory_space<vmem>>, vector<8x128xf32>
    %c0_2 = arith.constant 0 : index
    %c0_3 = arith.constant 0 : index
    %4 = vector.load %arg1[%c0_2, %c0_3] : memref<8x128xbf16, #tpu.memory_space<vmem>>, vector<8x128xbf16>
    %c0_4 = arith.constant 0 : index
    %c0_5 = arith.constant 0 : index
    %5 = vector.load %arg2[%c0_4, %c0_5] : memref<128x128xbf16, #tpu.memory_space<vmem>>, vector<128x128xbf16>
    %cst = arith.constant dense<0.000000e+00> : vector<8x128xf32>
    %6 = tpu.matmul %4, %5, %cst {dimension_numbers = #tpu.dot_dimension_numbers<[1], [0], [0], [1], [0, 0, 1, 1], [], []>} : vector<8x128xbf16>, vector<128x128xbf16>, vector<8x128xf32> -> vector<8x128xf32>
    %7 = arith.addf %3, %6 : vector<8x128xf32>
    %c0_6 = arith.constant 0 : index
    %c0_7 = arith.constant 0 : index
    %8 = vector.load %arg6[%c0_6, %c0_7] : memref<8x128xf32, #tpu.memory_space<vmem>>, vector<8x128xf32>
    tpu.vector_store %arg6[%c0_6, %c0_7], %7 {strides = array<i32>} : memref<8x128xf32, #tpu.memory_space<vmem>>, vector<8x128xf32>,
    %c0_i32_8 = arith.constant 0 : i32
    %9 = arith.cmpi eq, %arg0, %c0_i32_8 : i32
    %10 = arith.extui %9 : i1 to i32
    %c0_i32_9 = arith.constant 0 : i32
    %11 = arith.cmpi ne, %10, %c0_i32_9 : i32
    scf.if %11 {
      %c0_10 = arith.constant 0 : index
      %c0_11 = arith.constant 0 : index
      %12 = vector.load %arg6[%c0_10, %c0_11] : memref<8x128xf32, #tpu.memory_space<vmem>>, vector<8x128xf32>
      %13 = arith.mulf %12, %12 : vector<8x128xf32>
      %cst_12 = arith.constant dense<0.000000e+00> : vector<8xf32>
      %14 = vector.multi_reduction <add>, %13, %cst_12 [1] : vector<8x128xf32> to vector<8xf32>
      %15 = vector.shape_cast %14 : vector<8xf32> to vector<8x1xf32>
      %cst_13 = arith.constant 1.000000e-24 : f32
      %16 = vector.broadcast %cst_13 : f32 to vector<8x1xf32>
      %17 = arith.maximumf %15, %16 : vector<8x1xf32>
      %18 = math.rsqrt %17 : vector<8x1xf32>
      %19 = vector.broadcast %18 : vector<8x1xf32> to vector<8x128xf32>
      %20 = arith.mulf %12, %19 : vector<8x128xf32>
      %21 = arith.truncf %20 : vector<8x128xf32> to vector<8x128xbf16>
      %c0_14 = arith.constant 0 : index
      %c0_15 = arith.constant 0 : index
      %22 = vector.load %arg3[%c0_14, %c0_15] : memref<128x128xbf16, #tpu.memory_space<vmem>>, vector<128x128xbf16>
      %cst_16 = arith.constant dense<0.000000e+00> : vector<8x128xf32>
      %23 = tpu.matmul %21, %22, %cst_16 {dimension_numbers = #tpu.dot_dimension_numbers<[1], [0], [0], [1], [0, 0, 1, 1], [], []>} : vector<8x128xbf16>, vector<128x128xbf16>, vector<8x128xf32> -> vector<8x128xf32>
      %c0_17 = arith.constant 0 : index
      %c0_18 = arith.constant 0 : index
      %24 = vector.load %arg4[%c0_17, %c0_18] : memref<1x128xf32, #tpu.memory_space<vmem>>, vector<1x128xf32>
      %25 = vector.broadcast %24 : vector<1x128xf32> to vector<8x128xf32>
      %26 = arith.addf %23, %25 : vector<8x128xf32>
      %c0_19 = arith.constant 0 : index
      %c0_20 = arith.constant 0 : index
      %27 = vector.load %arg5[%c0_19, %c0_20] : memref<8x128xf32, #tpu.memory_space<vmem>>, vector<8x128xf32>
      tpu.vector_store %arg5[%c0_19, %c0_20], %26 {strides = array<i32>} : memref<8x128xf32, #tpu.memory_space<vmem>>, vector<8x128xf32>,
    } else {
    }
    return
  }
  func.func @transform_0(%arg0: i32) -> (i32, i32) {
    %c0_i32 = arith.constant 0 : i32
    %c0_i32_0 = arith.constant 0 : i32
    return %c0_i32, %arg0 : i32, i32
  }
  func.func @transform_1(%arg0: i32) -> (i32, i32) {
    %c0_i32 = arith.constant 0 : i32
    %c0_i32_0 = arith.constant 0 : i32
    return %arg0, %c0_i32 : i32, i32
  }
  func.func @transform_2(%arg0: i32) -> (i32, i32) {
    %c0_i32 = arith.constant 0 : i32
    %c0_i32_0 = arith.constant 0 : i32
    %c0_i32_1 = arith.constant 0 : i32
    return %c0_i32, %c0_i32_0 : i32, i32
  }
  func.func @transform_3(%arg0: i32) -> (i32, i32) {
    %c0_i32 = arith.constant 0 : i32
    %c0_i32_0 = arith.constant 0 : i32
    %c0_i32_1 = arith.constant 0 : i32
    return %c0_i32, %c0_i32_0 : i32, i32
  }
  func.func @transform_4(%arg0: i32) -> (i32, i32) {
    %c0_i32 = arith.constant 0 : i32
    %c0_i32_0 = arith.constant 0 : i32
    %c0_i32_1 = arith.constant 0 : i32
    return %c0_i32, %c0_i32_0 : i32, i32
  }
}

</mosaic_0001>

<bundles_post_ra>
// kernel: gnn_forward.4
= control target key start
LH: loop header
LB: loop body
LE: loop exit
PB: predicated region body
PF: predicated region fallthrough
CT: control target
= control target key end

     0   :  { %vm105_vm0 = vcmask 1043456   ;;  %vm80_vm1 = vcmask 64512   ;;  %s469_s2 = inlined_call_operand.vmem [shape: bf16[8,128], index: 2, kind: input, shape index: {}]   ;;  %s470_s1 = inlined_call_operand.vmem [shape: bf16[128,8], index: 1, kind: input, shape index: {}]   ;;  %s471_s3 = inlined_call_operand.vmem [shape: f32[1,128], index: 3, kind: input, shape index: {}]   ;;  %s472_s0 = inlined_call_operand.<no memory space> [shape: f32[1], index: 0, kind: input, shape index: {}]   ;;  %s473_s4 = inlined_call_operand.vmem [shape: bf16[128,128], index: 4, kind: output, shape index: {}]  }
   0x1   :  { %v35_v0 = vld [vmem:[%s469_s2] sm:$0xf]  ;;  %v286_v3 = vld [vmem:[%s470_s1 + $0x10] sm:$0xff]  ;;  %v285_v6 = vld [vmem:[%s470_s1 + $0x8] sm:$0xff]  ;;  %v413_v15 = vstv %s472_s0 }
   0x2   :  { %v107_v1 = vsel %vm105_vm0, %v35_v0, 0  ;;  %v284_v2 = vld [vmem:[%s470_s1] sm:$0xff]  ;;  %v290_v5 = vld [vmem:[%s470_s1 + $0x30] sm:$0xff]  ;;  %v287_v7 = vld [vmem:[%s470_s1 + $0x18] sm:$0xff] }
   0x3   :  { %116 = vmatpush.bf16.msra.mxu0 %v107_v1  ;;  %339 = vmatpush.bf16.msra.mxu1 %v107_v1  ;;  %v288_v4 = vld [vmem:[%s470_s1 + $0x20] sm:$0xff]  ;;  %v289_v8 = vld [vmem:[%s470_s1 + $0x28] sm:$0xff]  ;;  %v291_v9 = vld [vmem:[%s470_s1 + $0x38] sm:$0xff] }
   0x4   :  { %340 = vmatpush.bf16.msra.mxu2 %v107_v1  ;;  %341 = vmatpush.bf16.msra.mxu3 %v107_v1  ;;  %v406_v12 = vld [vmem:[%s471_s3] ss:$0 sm:$0xff] }
   0x6   :  { %276 = vmatmul.msk.bf16.vlgmr.msra.gmra.mxu0 %vm80_vm1, %v284_v2  ;;  %278 = vmatmul.msk.bf16.vlgmr.msra.gmra.mxu1 %vm80_vm1, %v286_v3 }
   0x7   :  { %280 = vmatmul.msk.bf16.vlgmr.msra.gmra.mxu2 %vm80_vm1, %v288_v4  ;;  %282 = vmatmul.msk.bf16.vlgmr.msra.gmra.mxu3 %vm80_vm1, %v290_v5 }
  0x16   :  { %277 = vmatmul.msk.bf16.gmra.mxu0 %vm80_vm1, %v285_v6  ;;  %279 = vmatmul.msk.bf16.gmra.mxu1 %vm80_vm1, %v287_v7 }
  0x17   :  { %281 = vmatmul.msk.bf16.gmra.mxu2 %vm80_vm1, %v289_v8  ;;  %283 = vmatmul.msk.bf16.gmra.mxu3 %vm80_vm1, %v291_v9 }
  0x83   :  { %v118_v10 = vpop.f32.mrf.mxu0  ;;  %v128_v11 = vpop.f32.mrf.mxu1 }
  0x84   :  { %v119_v13 = vadd.f32 %v406_v12, %v118_v10  ;;  %v129_v14 = vadd.f32 %v406_v12, %v128_v11 }
  0x86   :  { %v176_v20 = vmul.f32 %v413_v15, %v119_v13  ;;  %v180_v21 = vmul.f32 %v413_v15, %v129_v14  ;;  %vm159_vm2 = vcmp.ge.f32.partialorder %v119_v13, 0.0  ;;  %vm163_vm3 = vcmp.ge.f32.partialorder %v129_v14, 0.0 }
  0x88   :  { %v192_v28 = vsel %vm159_vm2, %v119_v13, %v176_v20  ;;  %v196_v29 = vsel %vm163_vm3, %v129_v14, %v180_v21 }
  0x8a   :  { %v138_v16 = vpop.f32.mrf.mxu2  ;;  %v148_v17 = vpop.f32.mrf.mxu3 }
  0x8b   :  { %v120_v18 = vpop.f32.mrf.mxu0  ;;  %v130_v19 = vpop.f32.mrf.mxu1  ;;  %v139_v26 = vadd.f32 %v406_v12, %v138_v16  ;;  %v149_v27 = vadd.f32 %v406_v12, %v148_v17 }
  0x8c   :  { %v121_v22 = vadd.f32 %v406_v12, %v120_v18  ;;  %v131_v23 = vadd.f32 %v406_v12, %v130_v19 }
  0x8d   :  { %v184_v36 = vmul.f32 %v413_v15, %v139_v26  ;;  %v188_v37 = vmul.f32 %v413_v15, %v149_v27  ;;  %vm167_vm6 = vcmp.ge.f32.partialorder %v139_v26, 0.0  ;;  %vm171_vm7 = vcmp.ge.f32.partialorder %v149_v27, 0.0 }
  0x8e   :  { %vm160_vm4 = vcmp.ge.f32.partialorder %v121_v22, 0.0  ;;  %v177_v24 = vmul.f32 %v413_v15, %v121_v22  ;;  %vm164_vm5 = vcmp.ge.f32.partialorder %v131_v23, 0.0  ;;  %v181_v25 = vmul.f32 %v413_v15, %v131_v23 }
  0x8f   :  { %v200_v44 = vsel %vm167_vm6, %v139_v26, %v184_v36  ;;  %v204_v45 = vsel %vm171_vm7, %v149_v27, %v188_v37 }
  0x90   :  { %v193_v30 = vsel %vm160_vm4, %v121_v22, %v177_v24  ;;  %v197_v31 = vsel %vm164_vm5, %v131_v23, %v181_v25 }
  0x91   :  { %v295_v32 = vpack.c.bf16 %v193_v30, %v192_v28  ;;  %v305_v33 = vpack.c.bf16 %v197_v31, %v196_v29 }
  0x92   :  { %v140_v34 = vpop.f32.mrf.mxu2  ;;  %v150_v35 = vpop.f32.mrf.mxu3 }
  0x93   :  { %296 = vst [vmem:[%s473_s4] sm:$0xff] %v295_v32   ;;  %v141_v38 = vadd.f32 %v406_v12, %v140_v34  ;;  %v151_v39 = vadd.f32 %v406_v12, %v150_v35  ;;  %v123_v40 = vpop.f32.mrf.mxu0  ;;  %v133_v41 = vpop.f32.mrf.mxu1 }
  0x94   :  { %333 = vst [vmem:[%s473_s4 + $0x10] sm:$0xff] %v305_v33   ;;  %v124_v50 = vadd.f32 %v406_v12, %v123_v40  ;;  %v134_v51 = vadd.f32 %v406_v12, %v133_v41 }
  0x95   :  { %vm168_vm8 = vcmp.ge.f32.partialorder %v141_v38, 0.0  ;;  %v185_v42 = vmul.f32 %v413_v15, %v141_v38  ;;  %vm172_vm9 = vcmp.ge.f32.partialorder %v151_v39, 0.0  ;;  %v189_v43 = vmul.f32 %v413_v15, %v151_v39 }
  0x96   :  { %v178_v56 = vmul.f32 %v413_v15, %v124_v50  ;;  %v182_v57 = vmul.f32 %v413_v15, %v134_v51  ;;  %vm161_vm10 = vcmp.ge.f32.partialorder %v124_v50, 0.0  ;;  %vm165_vm11 = vcmp.ge.f32.partialorder %v134_v51, 0.0 }
  0x97   :  { %v201_v46 = vsel %vm168_vm8, %v141_v38, %v185_v42  ;;  %v205_v47 = vsel %vm172_vm9, %v151_v39, %v189_v43 }
  0x98   :  { %v315_v48 = vpack.c.bf16 %v201_v46, %v200_v44  ;;  %v325_v49 = vpack.c.bf16 %v205_v47, %v204_v45  ;;  %v194_v0 = vsel %vm161_vm10, %v124_v50, %v178_v56  ;;  %v198_v1 = vsel %vm165_vm11, %v134_v51, %v182_v57 }
  0x9a   :  { %335 = vst [vmem:[%s473_s4 + $0x20] sm:$0xff] %v315_v48   ;;  %v143_v52 = vpop.f32.mrf.mxu2  ;;  %v153_v53 = vpop.f32.mrf.mxu3 }
  0x9b   :  { %337 = vst [vmem:[%s473_s4 + $0x30] sm:$0xff] %v325_v49   ;;  %v125_v54 = vpop.f32.mrf.mxu0  ;;  %v135_v55 = vpop.f32.mrf.mxu1  ;;  %v144_v62 = vadd.f32 %v406_v12, %v143_v52  ;;  %v154_v63 = vadd.f32 %v406_v12, %v153_v53 }
  0x9c   :  { %v126_v58 = vadd.f32 %v406_v12, %v125_v54  ;;  %v136_v59 = vadd.f32 %v406_v12, %v135_v55 }
  0x9d   :  { %v186_v8 = vmul.f32 %v413_v15, %v144_v62  ;;  %v190_v9 = vmul.f32 %v413_v15, %v154_v63  ;;  %vm169_vm14 = vcmp.ge.f32.partialorder %v144_v62, 0.0  ;;  %vm173_vm15 = vcmp.ge.f32.partialorder %v154_v63, 0.0 }
  0x9e   :  { %vm162_vm12 = vcmp.ge.f32.partialorder %v126_v58, 0.0  ;;  %v179_v60 = vmul.f32 %v413_v15, %v126_v58  ;;  %vm166_vm13 = vcmp.ge.f32.partialorder %v136_v59, 0.0  ;;  %v183_v61 = vmul.f32 %v413_v15, %v136_v59 }
  0x9f   :  { %v202_v16 = vsel %vm169_vm14, %v144_v62, %v186_v8  ;;  %v206_v17 = vsel %vm173_vm15, %v154_v63, %v190_v9 }
  0xa0   :  { %v195_v2 = vsel %vm162_vm12, %v126_v58, %v179_v60  ;;  %v199_v3 = vsel %vm166_vm13, %v136_v59, %v183_v61 }
  0xa1   :  { %v300_v4 = vpack.c.bf16 %v195_v2, %v194_v0  ;;  %v310_v5 = vpack.c.bf16 %v199_v3, %v198_v1 }
  0xa2   :  { %v145_v6 = vpop.f32.mrf.mxu2  ;;  %v155_v7 = vpop.f32.mrf.mxu3 }
  0xa3   :  { %332 = vst [vmem:[%s473_s4 + $0x8] sm:$0xff] %v300_v4   ;;  %v146_v10 = vadd.f32 %v406_v12, %v145_v6  ;;  %v156_v11 = vadd.f32 %v406_v12, %v155_v7 }
  0xa4   :  { %334 = vst [vmem:[%s473_s4 + $0x18] sm:$0xff] %v310_v5  }
  0xa5   :  { %vm170_vm0 = vcmp.ge.f32.partialorder %v146_v10, 0.0  ;;  %v187_v13 = vmul.f32 %v413_v15, %v146_v10  ;;  %vm174_vm1 = vcmp.ge.f32.partialorder %v156_v11, 0.0  ;;  %v191_v14 = vmul.f32 %v413_v15, %v156_v11 }
  0xa7   :  { %v203_v18 = vsel %vm170_vm0, %v146_v10, %v187_v13  ;;  %v207_v19 = vsel %vm174_vm1, %v156_v11, %v191_v14 }
  0xa8   :  { %v320_v20 = vpack.c.bf16 %v203_v18, %v202_v16  ;;  %v330_v21 = vpack.c.bf16 %v207_v19, %v206_v17 }
  0xaa   :  { %336 = vst [vmem:[%s473_s4 + $0x28] sm:$0xff] %v320_v20  }
  0xab   :  { %338 = vst [vmem:[%s473_s4 + $0x38] sm:$0xff] %v330_v21  }

// kernel: gnn_forward.5
= control target key start
LH: loop header
LB: loop body
LE: loop exit
PB: predicated region body
PF: predicated region fallthrough
CT: control target
= control target key end

     0   :  { %s848_s2 = inlined_call_operand.vmem [shape: bf16[128,128], index: 2, kind: input, shape index: {}]   ;;  %s849_s1 = inlined_call_operand.vmem [shape: bf16[128,128], index: 1, kind: input, shape index: {}]   ;;  %s850_s3 = inlined_call_operand.vmem [shape: bf16[128,128], index: 3, kind: input, shape index: {}]   ;;  %s851_s4 = inlined_call_operand.vmem [shape: f32[1,128], index: 4, kind: input, shape index: {}]   ;;  %s852_s0 = inlined_call_operand.<no memory space> [shape: f32[1], index: 0, kind: input, shape index: {}]   ;;  %s853_s5 = inlined_call_operand.vmem [shape: bf16[128,128], index: 5, kind: output, shape index: {}]  }
   0x1   :  { %v607_v0 = vld [vmem:[%s848_s2 + $0x38] sm:$0xff]  ;;  %v606_v1 = vld [vmem:[%s848_s2 + $0x30] sm:$0xff]  ;;  %v605_v2 = vld [vmem:[%s848_s2 + $0x28] sm:$0xff]  ;;  %v791_v51 = vstv %s852_s0 }
   0x2   :  { %185 = vmatpush.bf16.msra.mxu0 %v607_v0  ;;  %663 = vmatpush.bf16.msra.mxu2 %v607_v0  ;;  %v604_v3 = vld [vmem:[%s848_s2 + $0x20] sm:$0xff]  ;;  %v603_v4 = vld [vmem:[%s848_s2 + $0x18] sm:$0xff]  ;;  %v602_v5 = vld [vmem:[%s848_s2 + $0x10] sm:$0xff] }
   0x3   :  { %v601_v6 = vld [vmem:[%s848_s2 + $0x8] sm:$0xff]  ;;  %v600_v7 = vld [vmem:[%s848_s2] sm:$0xff]  ;;  %v615_v12 = vld [vmem:[%s850_s3 + $0x38] sm:$0xff] }
   0x4   :  { %v592_v8 = vld [vmem:[%s849_s1] sm:$0xff]  ;;  %v593_v10 = vld [vmem:[%s849_s1 + $0x8] sm:$0xff]  ;;  %361 = vmatpush.bf16.msra.mxu1 %v615_v12  ;;  %v614_v13 = vld [vmem:[%s850_s3 + $0x30] sm:$0xff]  ;;  %671 = vmatpush.bf16.msra.mxu3 %v615_v12 }
   0x5   :  { %v596_v9 = vld [vmem:[%s849_s1 + $0x20] sm:$0xff]  ;;  %v597_v11 = vld [vmem:[%s849_s1 + $0x28] sm:$0xff]  ;;  %v594_v16 = vld [vmem:[%s849_s1 + $0x10] sm:$0xff] }
   0x6   :  { %186 = vmatpush.bf16.msra.mxu0 %v606_v1  ;;  %664 = vmatpush.bf16.msra.mxu2 %v606_v1  ;;  %v613_v14 = vld [vmem:[%s850_s3 + $0x28] sm:$0xff]  ;;  %v612_v15 = vld [vmem:[%s850_s3 + $0x20] sm:$0xff]  ;;  %v598_v17 = vld [vmem:[%s849_s1 + $0x30] sm:$0xff] }
   0x7   :  { %v611_v18 = vld [vmem:[%s850_s3 + $0x18] sm:$0xff]  ;;  %v610_v21 = vld [vmem:[%s850_s3 + $0x10] sm:$0xff]  ;;  %v609_v22 = vld [vmem:[%s850_s3 + $0x8] sm:$0xff] }
   0x8   :  { %362 = vmatpush.bf16.msra.mxu1 %v614_v13  ;;  %672 = vmatpush.bf16.msra.mxu3 %v614_v13  ;;  %v595_v19 = vld [vmem:[%s849_s1 + $0x18] sm:$0xff]  ;;  %v608_v23 = vld [vmem:[%s850_s3] sm:$0xff] }
   0x9   :  { %v599_v20 = vld [vmem:[%s849_s1 + $0x38] sm:$0xff]  ;;  %v785_v49 = vld [vmem:[%s851_s4] ss:$0 sm:$0xff] }
   0xa   :  { %187 = vmatpush.bf16.msra.mxu0 %v605_v2  ;;  %665 = vmatpush.bf16.msra.mxu2 %v605_v2 }
   0xc   :  { %363 = vmatpush.bf16.msra.mxu1 %v613_v14  ;;  %673 = vmatpush.bf16.msra.mxu3 %v613_v14 }
   0xe   :  { %188 = vmatpush.bf16.msra.mxu0 %v604_v3  ;;  %666 = vmatpush.bf16.msra.mxu2 %v604_v3 }
  0x10   :  { %364 = vmatpush.bf16.msra.mxu1 %v612_v15  ;;  %674 = vmatpush.bf16.msra.mxu3 %v612_v15 }
  0x12   :  { %189 = vmatpush.bf16.msra.mxu0 %v603_v4  ;;  %667 = vmatpush.bf16.msra.mxu2 %v603_v4 }
  0x14   :  { %365 = vmatpush.bf16.msra.mxu1 %v611_v18  ;;  %675 = vmatpush.bf16.msra.mxu3 %v611_v18 }
  0x16   :  { %190 = vmatpush.bf16.msra.mxu0 %v602_v5  ;;  %668 = vmatpush.bf16.msra.mxu2 %v602_v5 }
  0x18   :  { %366 = vmatpush.bf16.msra.mxu1 %v610_v21  ;;  %676 = vmatpush.bf16.msra.mxu3 %v610_v21 }
  0x1a   :  { %191 = vmatpush.bf16.msra.mxu0 %v601_v6  ;;  %669 = vmatpush.bf16.msra.mxu2 %v601_v6 }
  0x1c   :  { %367 = vmatpush.bf16.msra.mxu1 %v609_v22  ;;  %677 = vmatpush.bf16.msra.mxu3 %v609_v22 }
  0x1e   :  { %192 = vmatpush.bf16.msra.mxu0 %v600_v7  ;;  %670 = vmatpush.bf16.msra.mxu2 %v600_v7 }
  0x20   :  { %368 = vmatpush.bf16.msra.mxu1 %v608_v23  ;;  %678 = vmatpush.bf16.msra.mxu3 %v608_v23 }
  0x21   :  { %193 = vmatmul.bf16.vlgmr.msra.gmra.mxu0 %v592_v8  ;;  %213 = vmatmul.bf16.vlgmr.msra.gmra.mxu2 %v596_v9 }
  0x31   :  { %198 = vmatmul.bf16.gmra.mxu0 %v593_v10  ;;  %218 = vmatmul.bf16.gmra.mxu2 %v597_v11 }
  0x41   :  { %203 = vmatmul.bf16.gmra.mxu0 %v594_v16  ;;  %223 = vmatmul.bf16.gmra.mxu2 %v598_v17 }
  0x51   :  { %208 = vmatmul.bf16.gmra.mxu0 %v595_v19  ;;  %228 = vmatmul.bf16.gmra.mxu2 %v599_v20 }
  0x9e   :  { %v194_v24 = vpop.f32.mrf.mxu0 }
  0xa4   :  { %v214_v25 = vpop.f32.mrf.mxu2 }
  0xa6   :  { %v196_v26 = vpop.f32.mrf.mxu0 }
  0xa7   :  { %v285_v27 = vpack.c.bf16 %v196_v26, %v194_v24 }
  0xa9   :  { %369 = vmatmul.bf16.vlgmr.msra.gmra.mxu1 %v285_v27 }
  0xac   :  { %v216_v28 = vpop.f32.mrf.mxu2 }
  0xad   :  { %v289_v29 = vpack.c.bf16 %v216_v28, %v214_v25 }
  0xae   :  { %v199_v30 = vpop.f32.mrf.mxu0 }
  0xaf   :  { %389 = vmatmul.bf16.vlgmr.msra.gmra.mxu3 %v289_v29 }
  0xb4   :  { %v219_v31 = vpop.f32.mrf.mxu2 }
  0xb6   :  { %v201_v32 = vpop.f32.mrf.mxu0 }
  0xb7   :  { %v286_v33 = vpack.c.bf16 %v201_v32, %v199_v30 }
  0xb9   :  { %374 = vmatmul.bf16.gmra.mxu1 %v286_v33 }
  0xbc   :  { %v221_v34 = vpop.f32.mrf.mxu2 }
  0xbd   :  { %v290_v35 = vpack.c.bf16 %v221_v34, %v219_v31 }
  0xbe   :  { %v204_v36 = vpop.f32.mrf.mxu0 }
  0xbf   :  { %394 = vmatmul.bf16.gmra.mxu3 %v290_v35 }
  0xc4   :  { %v224_v37 = vpop.f32.mrf.mxu2 }
  0xc6   :  { %v206_v38 = vpop.f32.mrf.mxu0 }
  0xc7   :  { %v287_v39 = vpack.c.bf16 %v206_v38, %v204_v36 }
  0xc9   :  { %379 = vmatmul.bf16.gmra.mxu1 %v287_v39 }
  0xcc   :  { %v226_v40 = vpop.f32.mrf.mxu2 }
  0xcd   :  { %v291_v41 = vpack.c.bf16 %v226_v40, %v224_v37 }
  0xce   :  { %v209_v42 = vpop.f32.mrf.mxu0 }
  0xcf   :  { %399 = vmatmul.bf16.gmra.mxu3 %v291_v41 }
  0xd4   :  { %v229_v43 = vpop.f32.mrf.mxu2 }
  0xd6   :  { %v211_v44 = vpop.f32.mrf.mxu0 }
  0xd7   :  { %v288_v45 = vpack.c.bf16 %v211_v44, %v209_v42 }
  0xd9   :  { %384 = vmatmul.bf16.gmra.mxu1 %v288_v45 }
  0xdc   :  { %v231_v46 = vpop.f32.mrf.mxu2 }
  0xdd   :  { %v292_v47 = vpack.c.bf16 %v231_v46, %v229_v43 }
  0xdf   :  { %404 = vmatmul.bf16.gmra.mxu3 %v292_v47 }
 0x126   :  { %v370_v48 = vpop.f32.mrf.mxu1 }
 0x127   :  { %v371_v50 = vadd.f32 %v785_v49, %v370_v48 }
 0x129   :  { %v428_v53 = vmul.f32 %v791_v51, %v371_v50  ;;  %vm411_vm0 = vcmp.ge.f32.partialorder %v371_v50, 0.0 }
 0x12b   :  { %v444_v57 = vsel %vm411_vm0, %v371_v50, %v428_v53 }
 0x12e   :  { %v372_v52 = vpop.f32.mrf.mxu1 }
 0x12f   :  { %v373_v54 = vadd.f32 %v785_v49, %v372_v52 }
 0x131   :  { %vm412_vm1 = vcmp.ge.f32.partialorder %v373_v54, 0.0  ;;  %v429_v55 = vmul.f32 %v791_v51, %v373_v54 }
 0x132   :  { %v390_v56 = vpop.f32.mrf.mxu3 }
 0x133   :  { %v445_v58 = vsel %vm412_vm1, %v373_v54, %v429_v55  ;;  %v391_v61 = vadd.f32 %v785_v49, %v390_v56 }
 0x134   :  { %v619_v59 = vpack.c.bf16 %v445_v58, %v444_v57 }
 0x135   :  { %v436_v63 = vmul.f32 %v791_v51, %v391_v61  ;;  %vm419_vm2 = vcmp.ge.f32.partialorder %v391_v61, 0.0 }
 0x136   :  { %620 = vst [vmem:[%s853_s5] sm:$0xff] %v619_v59   ;;  %v375_v60 = vpop.f32.mrf.mxu1 }
 0x137   :  { %v376_v0 = vadd.f32 %v785_v49, %v375_v60  ;;  %v452_v4 = vsel %vm419_vm2, %v391_v61, %v436_v63 }
 0x139   :  { %v430_v5 = vmul.f32 %v791_v51, %v376_v0  ;;  %vm413_vm4 = vcmp.ge.f32.partialorder %v376_v0, 0.0 }
 0x13a   :  { %v392_v62 = vpop.f32.mrf.mxu3 }
 0x13b   :  { %v393_v1 = vadd.f32 %v785_v49, %v392_v62  ;;  %v446_v11 = vsel %vm413_vm4, %v376_v0, %v430_v5 }
 0x13d   :  { %vm420_vm3 = vcmp.ge.f32.partialorder %v393_v1, 0.0  ;;  %v437_v2 = vmul.f32 %v791_v51, %v393_v1 }
 0x13e   :  { %v377_v3 = vpop.f32.mrf.mxu1 }
 0x13f   :  { %v453_v6 = vsel %vm420_vm3, %v393_v1, %v437_v2  ;;  %v378_v7 = vadd.f32 %v785_v49, %v377_v3 }
 0x140   :  { %v639_v8 = vpack.c.bf16 %v453_v6, %v452_v4 }
 0x141   :  { %vm414_vm5 = vcmp.ge.f32.partialorder %v378_v7, 0.0  ;;  %v431_v9 = vmul.f32 %v791_v51, %v378_v7 }
 0x142   :  { %659 = vst [vmem:[%s853_s5 + $0x20] sm:$0xff] %v639_v8   ;;  %v395_v10 = vpop.f32.mrf.mxu3 }
 0x143   :  { %v447_v12 = vsel %vm414_vm5, %v378_v7, %v431_v9  ;;  %v396_v15 = vadd.f32 %v785_v49, %v395_v10 }
 0x144   :  { %v624_v13 = vpack.c.bf16 %v447_v12, %v446_v11 }
 0x145   :  { %v438_v17 = vmul.f32 %v791_v51, %v396_v15  ;;  %vm421_vm6 = vcmp.ge.f32.partialorder %v396_v15, 0.0 }
 0x146   :  { %656 = vst [vmem:[%s853_s5 + $0x8] sm:$0xff] %v624_v13   ;;  %v380_v14 = vpop.f32.mrf.mxu1 }
 0x147   :  { %v381_v18 = vadd.f32 %v785_v49, %v380_v14  ;;  %v454_v22 = vsel %vm421_vm6, %v396_v15, %v438_v17 }
 0x149   :  { %v432_v23 = vmul.f32 %v791_v51, %v381_v18  ;;  %vm415_vm8 = vcmp.ge.f32.partialorder %v381_v18, 0.0 }
 0x14a   :  { %v397_v16 = vpop.f32.mrf.mxu3 }
 0x14b   :  { %v398_v19 = vadd.f32 %v785_v49, %v397_v16  ;;  %v448_v29 = vsel %vm415_vm8, %v381_v18, %v432_v23 }
 0x14d   :  { %vm422_vm7 = vcmp.ge.f32.partialorder %v398_v19, 0.0  ;;  %v439_v20 = vmul.f32 %v791_v51, %v398_v19 }
 0x14e   :  { %v382_v21 = vpop.f32.mrf.mxu1 }
 0x14f   :  { %v455_v24 = vsel %vm422_vm7, %v398_v19, %v439_v20  ;;  %v383_v25 = vadd.f32 %v785_v49, %v382_v21 }
 0x150   :  { %v644_v26 = vpack.c.bf16 %v455_v24, %v454_v22 }
 0x151   :  { %vm416_vm9 = vcmp.ge.f32.partialorder %v383_v25, 0.0  ;;  %v433_v27 = vmul.f32 %v791_v51, %v383_v25 }
 0x152   :  { %660 = vst [vmem:[%s853_s5 + $0x28] sm:$0xff] %v644_v26   ;;  %v400_v28 = vpop.f32.mrf.mxu3 }
 0x153   :  { %v449_v30 = vsel %vm416_vm9, %v383_v25, %v433_v27  ;;  %v401_v33 = vadd.f32 %v785_v49, %v400_v28 }
 0x154   :  { %v629_v31 = vpack.c.bf16 %v449_v30, %v448_v29 }
 0x155   :  { %v440_v35 = vmul.f32 %v791_v51, %v401_v33  ;;  %vm423_vm10 = vcmp.ge.f32.partialorder %v401_v33, 0.0 }
 0x156   :  { %657 = vst [vmem:[%s853_s5 + $0x10] sm:$0xff] %v629_v31   ;;  %v385_v32 = vpop.f32.mrf.mxu1 }
 0x157   :  { %v386_v36 = vadd.f32 %v785_v49, %v385_v32  ;;  %v456_v40 = vsel %vm423_vm10, %v401_v33, %v440_v35 }
 0x159   :  { %v434_v41 = vmul.f32 %v791_v51, %v386_v36  ;;  %vm417_vm12 = vcmp.ge.f32.partialorder %v386_v36, 0.0 }
 0x15a   :  { %v402_v34 = vpop.f32.mrf.mxu3 }
 0x15b   :  { %v403_v37 = vadd.f32 %v785_v49, %v402_v34  ;;  %v450_v47 = vsel %vm417_vm12, %v386_v36, %v434_v41 }
 0x15d   :  { %vm424_vm11 = vcmp.ge.f32.partialorder %v403_v37, 0.0  ;;  %v441_v38 = vmul.f32 %v791_v51, %v403_v37 }
 0x15e   :  { %v387_v39 = vpop.f32.mrf.mxu1 }
 0x15f   :  { %v457_v42 = vsel %vm424_vm11, %v403_v37, %v441_v38  ;;  %v388_v43 = vadd.f32 %v785_v49, %v387_v39 }
 0x160   :  { %v649_v44 = vpack.c.bf16 %v457_v42, %v456_v40 }
 0x161   :  { %vm418_vm13 = vcmp.ge.f32.partialorder %v388_v43, 0.0  ;;  %v435_v45 = vmul.f32 %v791_v51, %v388_v43 }
 0x162   :  { %661 = vst [vmem:[%s853_s5 + $0x30] sm:$0xff] %v649_v44   ;;  %v405_v46 = vpop.f32.mrf.mxu3 }
 0x163   :  { %v451_v48 = vsel %vm418_vm13, %v388_v43, %v435_v45  ;;  %v406_v52 = vadd.f32 %v785_v49, %v405_v46 }
 0x164   :  { %v634_v50 = vpack.c.bf16 %v451_v48, %v450_v47 }
 0x165   :  { %v442_v54 = vmul.f32 %v791_v51, %v406_v52  ;;  %vm425_vm14 = vcmp.ge.f32.partialorder %v406_v52, 0.0 }
 0x166   :  { %658 = vst [vmem:[%s853_s5 + $0x18] sm:$0xff] %v634_v50  }
 0x167   :  { %v458_v57 = vsel %vm425_vm14, %v406_v52, %v442_v54 }
 0x16a   :  { %v407_v53 = vpop.f32.mrf.mxu3 }
 0x16b   :  { %v408_v55 = vadd.f32 %v785_v49, %v407_v53 }
 0x16d   :  { %vm426_vm15 = vcmp.ge.f32.partialorder %v408_v55, 0.0  ;;  %v443_v56 = vmul.f32 %v791_v51, %v408_v55 }
 0x16f   :  { %v459_v58 = vsel %vm426_vm15, %v408_v55, %v443_v56 }
 0x170   :  { %v654_v59 = vpack.c.bf16 %v459_v58, %v458_v57 }
 0x172   :  { %662 = vst [vmem:[%s853_s5 + $0x38] sm:$0xff] %v654_v59  }

// kernel: gnn_forward.7
= control target key start
LH: loop header
LB: loop body
LE: loop exit
PB: predicated region body
PF: predicated region fallthrough
CT: control target
= control target key end

     0   :  { %s374_s1 = inlined_call_operand.vmem [shape: bf16[128,128], index: 1, kind: input, shape index: {}]   ;;  %s375_s0 = inlined_call_operand.vmem [shape: bf16[8,128], index: 0, kind: input, shape index: {}]   ;;  %s376_s2 = inlined_call_operand.vmem [shape: bf16[128,128], index: 2, kind: input, shape index: {}]   ;;  %s377_s3 = inlined_call_operand.vmem [shape: f32[1,128], index: 3, kind: input, shape index: {}]   ;;  %s378_s4 = inlined_call_operand.vmem [shape: f32[8,128], index: 4, kind: output, shape index: {}]  }
   0x1   :  { %v280_v0 = vld [vmem:[%s374_s1 + $0x38] sm:$0xff]  ;;  %v279_v1 = vld [vmem:[%s374_s1 + $0x30] sm:$0xff]  ;;  %v278_v2 = vld [vmem:[%s374_s1 + $0x28] sm:$0xff] }
   0x2   :  { %88 = vmatpush.bf16.msra.mxu0 %v280_v0  ;;  %v277_v3 = vld [vmem:[%s374_s1 + $0x20] sm:$0xff]  ;;  %v276_v4 = vld [vmem:[%s374_s1 + $0x18] sm:$0xff]  ;;  %v275_v5 = vld [vmem:[%s374_s1 + $0x10] sm:$0xff] }
   0x3   :  { %v274_v6 = vld [vmem:[%s374_s1 + $0x8] sm:$0xff]  ;;  %v273_v7 = vld [vmem:[%s374_s1] sm:$0xff]  ;;  %v288_v9 = vld [vmem:[%s376_s2 + $0x38] sm:$0xff] }
   0x4   :  { %v23_v8 = vld [vmem:[%s375_s0] sm:$0xf]  ;;  %191 = vmatpush.bf16.msra.mxu1 %v288_v9  ;;  %v287_v10 = vld [vmem:[%s376_s2 + $0x30] sm:$0xff]  ;;  %v286_v14 = vld [vmem:[%s376_s2 + $0x28] sm:$0xff] }
   0x5   :  { %v285_v15 = vld [vmem:[%s376_s2 + $0x20] sm:$0xff]  ;;  %v284_v16 = vld [vmem:[%s376_s2 + $0x18] sm:$0xff]  ;;  %v283_v17 = vld [vmem:[%s376_s2 + $0x10] sm:$0xff] }
   0x6   :  { %89 = vmatpush.bf16.msra.mxu0 %v279_v1  ;;  %v282_v18 = vld [vmem:[%s376_s2 + $0x8] sm:$0xff]  ;;  %v281_v19 = vld [vmem:[%s376_s2] sm:$0xff] }
   0x7   :  { %v289_v31 = vld [vmem:[%s377_s3] ss:$0 sm:$0xff] }
   0x8   :  { %192 = vmatpush.bf16.msra.mxu1 %v287_v10 }
   0xa   :  { %90 = vmatpush.bf16.msra.mxu0 %v278_v2 }
   0xc   :  { %193 = vmatpush.bf16.msra.mxu1 %v286_v14 }
   0xe   :  { %91 = vmatpush.bf16.msra.mxu0 %v277_v3 }
  0x10   :  { %194 = vmatpush.bf16.msra.mxu1 %v285_v15 }
  0x12   :  { %92 = vmatpush.bf16.msra.mxu0 %v276_v4 }
  0x14   :  { %195 = vmatpush.bf16.msra.mxu1 %v284_v16 }
  0x16   :  { %93 = vmatpush.bf16.msra.mxu0 %v275_v5 }
  0x18   :  { %196 = vmatpush.bf16.msra.mxu1 %v283_v17 }
  0x1a   :  { %94 = vmatpush.bf16.msra.mxu0 %v274_v6 }
  0x1c   :  { %197 = vmatpush.bf16.msra.mxu1 %v282_v18 }
  0x1e   :  { %95 = vmatpush.bf16.msra.mxu0 %v273_v7 }
  0x20   :  { %198 = vmatpush.bf16.msra.mxu1 %v281_v19 }
  0x21   :  { %96 = vmatmul.bf16.vlgmr.msra.gmra.mxu0 %v23_v8 }
  0x9e   :  { %v97_v11 = vpop.f32.mrf.mxu0 }
  0x9f   :  { %v107_v12 = vmul.f32 %v97_v11, %v97_v11 }
  0xa1   :  { %108 = vadd.xlane.f32.xlu0 %v107_v12 }
  0xa6   :  { %v99_v13 = vpop.f32.mrf.mxu0 }
 0x114   :  { %v109_v20 = vpop.xlane.xlu0 %108 }
 0x115   :  { %v110_v21 = vmax.f32 %v109_v20, 1e-24 }
 0x117   :  { %290 = vrsqrt.f32 %v110_v21  ;;  %vm117_vm1 = vweird.f32 %v110_v21 }
 0x11d   :  { %v291_v22 = vpop.eup %290 }
 0x11e   :  { %v112_v23 = vmul.f32 %v291_v22, %v110_v21  ;;  %vm118_vm0 = vweird.f32 %v291_v22 }
 0x11f   :  { %vm119_vm2 = vmor %vm117_vm1, %vm118_vm0 }
 0x120   :  { %v113_v24 = vmul.f32 %v291_v22, %v112_v23 }
 0x122   :  { %v114_v25 = vmul.f32 0.5, %v113_v24 }
 0x124   :  { %v115_v26 = vsub.f32 1.5, %v114_v25 }
 0x126   :  { %v116_v27 = vmul.f32 %v291_v22, %v115_v26 }
 0x128   :  { %v120_v28 = vsel %vm119_vm2, %v291_v22, %v116_v27 }
 0x129   :  { %v121_v29 = vmul.f32 %v120_v28, %v97_v11 }
 0x12b   :  { %v122_v30 = vpack.c.bf16 %v121_v29, %v121_v29 }
 0x12d   :  { %199 = vmatmul.bf16.vlgmr.msra.gmra.mxu1 %v122_v30 }
 0x1aa   :  { %v200_v32 = vpop.f32.mrf.mxu1 }
 0x1ab   :  { %v201_v33 = vadd.f32 %v289_v31, %v200_v32 }
 0x1ad   :  { %204 = vst [vmem:[%s378_s4] sm:$0xff] %v201_v33 }
 0x1b2   :  { %v202_v34 = vpop.f32.mrf.mxu1 }

</bundles_post_ra>
